<compile_context>
chip_gen: v6e
topology: v6e:2x2x1
jax: 0.10.0
libtpu: 0.0.40
codegen_flags: <defaults>
</compile_context>

<pallas_src>
import jax
import jax.numpy as jnp
from jax.experimental import pallas as pl
from jax.experimental.pallas import tpu as pltpu


# ---------------------------------------------------------------------------
# Kernel
# ---------------------------------------------------------------------------
def _make_kernel(inv_hw):
    """inv_hw: static Python float = 1/(H*W); applied once at finalize so the
    accumulator holds the raw spatial sum during the streaming phase."""

    def kernel(x_ref, w1_ref, b1_ref, w2_ref, b2_ref, o_ref, acc_ref):
        # x_ref : (TB, C, THW)  input tile, native dtype (f32 / bf16 / ...)
        # w1_ref: (C, H1)       resident weight
        # b1_ref: (1, H1)       f32
        # w2_ref: (H1, OUT)     resident weight
        # b2_ref: (1, OUT)      f32
        # o_ref : (TB, OUT)
        # acc_ref: (TB, C) f32  pooled-sum accumulator (VMEM scratch)
        hw_idx = pl.program_id(1)

        @pl.when(hw_idx == 0)
        def _():
            acc_ref[...] = jnp.zeros_like(acc_ref)

        # AdaptiveAvgPool2d(1) + Flatten: accumulate the spatial sum in f32.
        # x streams in its native dtype; upcast happens here on the VPU.
        # TODO(synk): on v7x with very large C this lane-axis reduce can become
        # the binding XLU slot; a channels-last (NHWC) producer layout (sublane
        # reduce / MXU matvec) would move it off that slot without an extra
        # wrapper-side HBM transpose of x.
        acc_ref[...] += jnp.sum(x_ref[...].astype(jnp.float32), axis=-1)

        @pl.when(hw_idx == pl.num_programs(1) - 1)
        def _():
            pooled = acc_ref[...] * inv_hw             # mean (free VPU multiply)
            # Dropout(0.2): identity in eval mode.
            h = jnp.dot(pooled.astype(w1_ref.dtype), w1_ref[...],
                        preferred_element_type=jnp.float32) + b1_ref[...]
            h = h * jax.nn.sigmoid(h)                  # SiLU (EUP)
            # Dropout(0.2): identity in eval mode.
            out = jnp.dot(h.astype(w2_ref.dtype), w2_ref[...],
                          preferred_element_type=jnp.float32) + b2_ref[...]
            o_ref[...] = out.astype(o_ref.dtype)

    return kernel


# ---------------------------------------------------------------------------
# Tiling / VMEM helpers
# ---------------------------------------------------------------------------
def _ceil_to(n, m):
    return ((n + m - 1) // m) * m


def _physical_vmem_bytes():
    try:
        return int(pltpu.get_tpu_info().vmem_capacity_bytes)
    except Exception:
        return 64 << 20  # conservative (v7x per-core VMEM)


def _weight_vmem_bytes(C, H1, OUT, w_itemsize):
    """Padded VMEM footprint of one copy of (w1, b1, w2, b2)."""
    return (_ceil_to(C, 8) * _ceil_to(H1, 128) * w_itemsize
            + 8 * _ceil_to(H1, 128) * 4
            + _ceil_to(H1, 8) * _ceil_to(OUT, 128) * w_itemsize
            + 8 * _ceil_to(OUT, 128) * 4)


def _auto_x_budget(phys_vmem, weight_bytes):
    """Per-buffer budget for the double-buffered x stream, per generation:
    ~40 MiB on 128-MiB-VMEM parts (v5e/v6e), ~14 MiB on 64-MiB parts (v7x)."""
    per_buf_cap = (40 << 20) if phys_vmem >= (100 << 20) else (14 << 20)
    avail = phys_vmem - weight_bytes - (8 << 20)       # acc / out / misc headroom
    return int(max(2 << 20, min(avail // 2, per_buf_cap)))


def _largest_divisor(total, cap, granule):
    """Largest divisor d of `total` with d <= cap and (d % granule == 0 or
    d == total).  None if no such divisor exists."""
    cap = min(cap, total)
    for d in range(cap, 0, -1):
        if total % d == 0 and (d == total or d % granule == 0):
            return d
    return None


def _choose_tiles(B, C, HW, x_itemsize, budget):
    # Batch tile must be a multiple of 8 (or the full B) because of the
    # (TB, OUT) output block.  Keep >= 2 batch steps whenever B permits so
    # v7x's two TensorCores both get work along the "parallel" axis
    # (harmless extra grid step on single-TC chips).
    tb_cap = 128
    if B >= 16:
        tb_cap = min(tb_cap, B // 2)
    TB = _largest_divisor(B, tb_cap, 8) or B

    while True:
        max_hw = max(1, budget // max(1, TB * C * x_itemsize))
        THW = _largest_divisor(HW, max_hw, 128)
        if THW is not None:
            return TB, THW
        # HW has no 128-multiple divisor that fits the budget (e.g. 49, 196):
        # the spatial tile must then be the full HW.  Shrink TB rather than
        # silently blowing the VMEM budget.
        if TB * C * HW * x_itemsize <= budget:
            return TB, HW
        smaller = _largest_divisor(B, TB - 1, 8) if TB > 1 else None
        if smaller is None or smaller >= TB:
            return TB, HW   # cannot shrink further; vmem_limit sized to actual tiles
        TB = smaller


def _vmem_limit_bytes(TB, C, THW, H1, OUT, x_itemsize, w_itemsize,
                      weight_buffers, phys_vmem):
    sub = 8 * max(1, 4 // x_itemsize)                 # sublane packing granule
    x_buf = TB * _ceil_to(C, sub) * _ceil_to(THW, 128) * x_itemsize
    out_buf = _ceil_to(TB, 8) * _ceil_to(OUT, 128) * 4
    acc = _ceil_to(TB, 8) * _ceil_to(C, 128) * 4
    need = (2 * x_buf                                  # double-buffered x stream
            + weight_buffers * _weight_vmem_bytes(C, H1, OUT, w_itemsize)
            + 2 * out_buf + acc + (1 << 20))           # misc / internal scratch
    limit = max(int(need * 1.25), 32 << 20)            # headroom, >= common default
    cap = int(phys_vmem * 0.9)
    return int(min(limit, max(cap, int(need * 1.05))))


# ---------------------------------------------------------------------------
# Wrapper
# ---------------------------------------------------------------------------
def linear_head_forward(x_nchw, w1, b1, w2, b2, *,
                        weights_dtype=None,
                        vmem_budget_bytes=None,
                        single_buffer_weights=True):
    """x_nchw: (B, C, H, W); w1: (H1, C); b1: (H1,); w2: (OUT, H1); b2: (OUT,).

    weights_dtype: optionally bf16 to halve resident weight VMEM / use the
    MXU's native bf16 rate (default: keep the given weight dtype for parity).
    """
    B, C, H, W = x_nchw.shape
    HW = H * W
    H1 = w1.shape[0]
    OUT = w2.shape[0]

    # Free reshape only -- x streams through the kernel in its native dtype.
    x3 = x_nchw.reshape(B, C, HW)
    x_itemsize = jnp.dtype(x3.dtype).itemsize

    w_dtype = jnp.dtype(weights_dtype) if weights_dtype is not None else jnp.dtype(w1.dtype)
    w_itemsize = w_dtype.itemsize
    # Tiny tensors: transpose / cast once in the wrapper.
    w1t = jnp.transpose(w1).astype(w_dtype)            # (C, H1)
    w2t = jnp.transpose(w2).astype(w_dtype)            # (H1, OUT)
    b1r = b1.reshape(1, H1).astype(jnp.float32)
    b2r = b2.reshape(1, OUT).astype(jnp.float32)

    out_dtype = jnp.result_type(x3.dtype, w_dtype)

    phys_vmem = _physical_vmem_bytes()
    weight_bytes = _weight_vmem_bytes(C, H1, OUT, w_itemsize)
    if vmem_budget_bytes is None:
        vmem_budget_bytes = _auto_x_budget(phys_vmem, weight_bytes)

    TB, THW = _choose_tiles(B, C, HW, x_itemsize, vmem_budget_bytes)
    grid = (B // TB, HW // THW)

    kernel = _make_kernel(1.0 / HW)

    cost = pl.CostEstimate(
        flops=int(B * C * HW + 2 * B * C * H1 + 2 * B * H1 * OUT),
        transcendentals=int(B * H1),
        bytes_accessed=int(B * C * HW * x_itemsize
                           + (C * H1 + H1 * OUT) * w_itemsize
                           + (H1 + OUT) * 4
                           + B * OUT * jnp.dtype(out_dtype).itemsize),
    )

    def _call(single_buffer):
        # Constant index_maps already skip re-DMA after the first fetch;
        # Buffered(1) additionally reclaims the second (wasted) weight buffer.
        weight_kwargs = dict(pipeline_mode=pl.Buffered(1)) if single_buffer else {}
        in_specs = [
            pl.BlockSpec((TB, C, THW), lambda i, j: (i, 0, j)),          # x stream
            pl.BlockSpec((C, H1), lambda i, j: (0, 0), **weight_kwargs),  # w1 (resident)
            pl.BlockSpec((1, H1), lambda i, j: (0, 0), **weight_kwargs),  # b1
            pl.BlockSpec((H1, OUT), lambda i, j: (0, 0), **weight_kwargs),  # w2
            pl.BlockSpec((1, OUT), lambda i, j: (0, 0), **weight_kwargs),   # b2
        ]
        vmem_limit = _vmem_limit_bytes(
            TB, C, THW, H1, OUT, x_itemsize, w_itemsize,
            weight_buffers=1 if single_buffer else 2, phys_vmem=phys_vmem)
        return pl.pallas_call(
            kernel,
            out_shape=jax.ShapeDtypeStruct((B, OUT), out_dtype),
            grid_spec=pltpu.PrefetchScalarGridSpec(
                num_scalar_prefetch=0,
                grid=grid,
                in_specs=in_specs,
                out_specs=pl.BlockSpec((TB, OUT), lambda i, j: (i, 0)),
                scratch_shapes=[pltpu.VMEM((TB, C), jnp.float32)],
            ),
            compiler_params=pltpu.CompilerParams(
                dimension_semantics=("parallel", "arbitrary"),
                vmem_limit_bytes=int(vmem_limit),
            ),
            cost_estimate=cost,
        )(x3, w1t, b1r, w2t, b2r)

    if single_buffer_weights:
        try:
            return _call(True)
        except Exception:
            # pl.Buffered(1) not supported on this JAX/Mosaic version:
            # fall back to default (double-buffered) resident weights.
            pass
    return _call(False)


# ---------------------------------------------------------------------------
# Self-test
# ---------------------------------------------------------------------------
if __name__ == "__main__":
    # Small, deterministic example consistent with the module's forward:
    # in_ = C = 32, out_ = 8, input NCHW = (2, 32, 16, 16)
    B, C, H, W = 2, 32, 16, 16
    OUT = 8
    H1 = C // 2

    key = jax.random.PRNGKey(0)
    kx, k1, k2, k3, k4 = jax.random.split(key, 5)

    x = jax.random.normal(kx, (B, C, H, W), dtype=jnp.float32)

    # PyTorch Linear default init: U(-1/sqrt(fan_in), 1/sqrt(fan_in))
    bound1 = 1.0 / jnp.sqrt(C)
    w1 = jax.random.uniform(k1, (H1, C), jnp.float32, -bound1, bound1)
    b1 = jax.random.uniform(k2, (H1,), jnp.float32, -bound1, bound1)
    bound2 = 1.0 / jnp.sqrt(H1)
    w2 = jax.random.uniform(k3, (OUT, H1), jnp.float32, -bound2, bound2)
    b2 = jax.random.uniform(k4, (OUT,), jnp.float32, -bound2, bound2)

    # Pure-JAX reference (eval-mode dropout = identity)
    def reference(xf):
        pooled = jnp.mean(xf.astype(jnp.float32), axis=(2, 3))
        h = pooled @ w1.T + b1
        h = h * jax.nn.sigmoid(h)
        return h @ w2.T + b2

    ref = reference(x)

    # 1) Auto (per-generation) VMEM budget, f32 input, single spatial step.
    out = jax.block_until_ready(linear_head_forward(x, w1, b1, w2, b2))
    assert out.shape == (B, OUT)
    assert jnp.allclose(out, ref, atol=1e-5, rtol=1e-5)

    # 2) Force a tiny x budget to exercise the multi-step spatial accumulation
    #    (grid = (1, 2)) and the pl.when init/finalize logic.
    out_tiled = jax.block_until_ready(
        linear_head_forward(x, w1, b1, w2, b2, vmem_budget_bytes=32 * 1024))
    assert jnp.allclose(out_tiled, ref, atol=1e-5, rtol=1e-5)

    # 3) Native-dtype streaming: bf16 activations are NOT upcast in the
    #    wrapper; the kernel upcasts when accumulating into the f32 scratch.
    x_bf16 = x.astype(jnp.bfloat16)
    out_bf16 = jax.block_until_ready(linear_head_forward(x_bf16, w1, b1, w2, b2))
    assert out_bf16.dtype == jnp.float32
    assert jnp.allclose(out_bf16, reference(x_bf16), atol=1e-2, rtol=1e-2)

    print("KERNEL_OK")
</pallas_src>

<mosaic_0001>
module attributes {stable_mosaic.version = 11 : i64} {
  func.func @kernel(%arg0: i32, %arg1: i32, %arg2: memref<2x32x256xf32, #tpu.memory_space<vmem>>, %arg3: memref<32x16xf32, #tpu.memory_space<vmem>>, %arg4: memref<1x16xf32, #tpu.memory_space<vmem>>, %arg5: memref<16x8xf32, #tpu.memory_space<vmem>>, %arg6: memref<1x8xf32, #tpu.memory_space<vmem>>, %arg7: memref<2x8xf32, #tpu.memory_space<vmem>>, %arg8: memref<2x32xf32, #tpu.memory_space<vmem>>) attributes {dimension_semantics = [#tpu.dimension_semantics<parallel>, #tpu.dimension_semantics<arbitrary>], iteration_bounds = array<i64: 1, 1>, scalar_prefetch = 0 : i64, scratch_operands = 1 : i64, tpu.core_type = #tpu.core_type<tc>, window_params = [{transform_indices = @transform_0, window_bounds = array<i64: 2, 32, 256>}, {pipeline_mode = #tpu.pipeline_mode<synchronous>, transform_indices = @transform_1, window_bounds = array<i64: 32, 16>}, {pipeline_mode = #tpu.pipeline_mode<synchronous>, transform_indices = @transform_2, window_bounds = array<i64: 1, 16>}, {pipeline_mode = #tpu.pipeline_mode<synchronous>, transform_indices = @transform_3, window_bounds = array<i64: 16, 8>}, {pipeline_mode = #tpu.pipeline_mode<synchronous>, transform_indices = @transform_4, window_bounds = array<i64: 1, 8>}, {transform_indices = @transform_5, window_bounds = array<i64: 2, 8>}]} {
    %c0_i32 = arith.constant 0 : i32
    %0 = arith.cmpi eq, %arg1, %c0_i32 : i32
    %1 = arith.extui %0 : i1 to i32
    %c0_i32_0 = arith.constant 0 : i32
    %2 = arith.cmpi ne, %1, %c0_i32_0 : i32
    scf.if %2 {
      %cst_9 = arith.constant 0.000000e+00 : f32
      %11 = vector.broadcast %cst_9 : f32 to vector<2x32xf32>
      %c0_10 = arith.constant 0 : index
      %c0_11 = arith.constant 0 : index
      %12 = vector.load %arg8[%c0_10, %c0_11] : memref<2x32xf32, #tpu.memory_space<vmem>>, vector<2x32xf32>
      tpu.vector_store %arg8[%c0_10, %c0_11], %11 {strides = array<i32>} : memref<2x32xf32, #tpu.memory_space<vmem>>, vector<2x32xf32>,
    } else {
    }
    %c0 = arith.constant 0 : index
    %c0_1 = arith.constant 0 : index
    %3 = vector.load %arg8[%c0, %c0_1] : memref<2x32xf32, #tpu.memory_space<vmem>>, vector<2x32xf32>
    %c0_2 = arith.constant 0 : index
    %c0_3 = arith.constant 0 : index
    %c0_4 = arith.constant 0 : index
    %4 = vector.load %arg2[%c0_2, %c0_3, %c0_4] : memref<2x32x256xf32, #tpu.memory_space<vmem>>, vector<2x32x256xf32>
    %cst = arith.constant dense<0.000000e+00> : vector<2x32xf32>
    %5 = vector.multi_reduction <add>, %4, %cst [2] : vector<2x32x256xf32> to vector<2x32xf32>
    %6 = arith.addf %3, %5 : vector<2x32xf32>
    %c0_5 = arith.constant 0 : index
    %c0_6 = arith.constant 0 : index
    %7 = vector.load %arg8[%c0_5, %c0_6] : memref<2x32xf32, #tpu.memory_space<vmem>>, vector<2x32xf32>
    tpu.vector_store %arg8[%c0_5, %c0_6], %6 {strides = array<i32>} : memref<2x32xf32, #tpu.memory_space<vmem>>, vector<2x32xf32>,
    %c0_i32_7 = arith.constant 0 : i32
    %8 = arith.cmpi eq, %arg1, %c0_i32_7 : i32
    %9 = arith.extui %8 : i1 to i32
    %c0_i32_8 = arith.constant 0 : i32
    %10 = arith.cmpi ne, %9, %c0_i32_8 : i32
    scf.if %10 {
      %c0_9 = arith.constant 0 : index
      %c0_10 = arith.constant 0 : index
      %11 = vector.load %arg8[%c0_9, %c0_10] : memref<2x32xf32, #tpu.memory_space<vmem>>, vector<2x32xf32>
      %cst_11 = arith.constant 3.906250e-03 : f32
      %12 = vector.broadcast %cst_11 : f32 to vector<2x32xf32>
      %13 = arith.mulf %11, %12 : vector<2x32xf32>
      %c0_12 = arith.constant 0 : index
      %c0_13 = arith.constant 0 : index
      %14 = vector.load %arg3[%c0_12, %c0_13] : memref<32x16xf32, #tpu.memory_space<vmem>>, vector<32x16xf32>
      %cst_14 = arith.constant dense<0.000000e+00> : vector<2x16xf32>
      %15 = tpu.matmul %13, %14, %cst_14 {dimension_numbers = #tpu.dot_dimension_numbers<[1], [0], [0], [1], [0, 0, 1, 1], [], []>} : vector<2x32xf32>, vector<32x16xf32>, vector<2x16xf32> -> vector<2x16xf32>
      %c0_15 = arith.constant 0 : index
      %c0_16 = arith.constant 0 : index
      %16 = vector.load %arg4[%c0_15, %c0_16] : memref<1x16xf32, #tpu.memory_space<vmem>>, vector<1x16xf32>
      %17 = vector.broadcast %16 : vector<1x16xf32> to vector<2x16xf32>
      %18 = arith.addf %15, %17 : vector<2x16xf32>
      %19 = arith.negf %18 : vector<2x16xf32>
      %20 = math.exp %19 : vector<2x16xf32>
      %cst_17 = arith.constant 1.000000e+00 : f32
      %21 = vector.broadcast %cst_17 : f32 to vector<2x16xf32>
      %22 = arith.addf %21, %20 : vector<2x16xf32>
      %23 = arith.divf %21, %22 : vector<2x16xf32>
      %24 = arith.mulf %18, %23 : vector<2x16xf32>
      %c0_18 = arith.constant 0 : index
      %c0_19 = arith.constant 0 : index
      %25 = vector.load %arg5[%c0_18, %c0_19] : memref<16x8xf32, #tpu.memory_space<vmem>>, vector<16x8xf32>
      %cst_20 = arith.constant dense<0.000000e+00> : vector<2x8xf32>
      %26 = tpu.matmul %24, %25, %cst_20 {dimension_numbers = #tpu.dot_dimension_numbers<[1], [0], [0], [1], [0, 0, 1, 1], [], []>} : vector<2x16xf32>, vector<16x8xf32>, vector<2x8xf32> -> vector<2x8xf32>
      %c0_21 = arith.constant 0 : index
      %c0_22 = arith.constant 0 : index
      %27 = vector.load %arg6[%c0_21, %c0_22] : memref<1x8xf32, #tpu.memory_space<vmem>>, vector<1x8xf32>
      %28 = vector.broadcast %27 : vector<1x8xf32> to vector<2x8xf32>
      %29 = arith.addf %26, %28 : vector<2x8xf32>
      %c0_23 = arith.constant 0 : index
      %c0_24 = arith.constant 0 : index
      %30 = vector.load %arg7[%c0_23, %c0_24] : memref<2x8xf32, #tpu.memory_space<vmem>>, vector<2x8xf32>
      tpu.vector_store %arg7[%c0_23, %c0_24], %29 {strides = array<i32>} : memref<2x8xf32, #tpu.memory_space<vmem>>, vector<2x8xf32>,
    } else {
    }
    return
  }
  func.func @transform_0(%arg0: i32, %arg1: i32) -> (i32, i32, i32) {
    %c0_i32 = arith.constant 0 : i32
    %c0_i32_0 = arith.constant 0 : i32
    return %arg0, %c0_i32, %arg1 : i32, i32, i32
  }
  func.func @transform_1(%arg0: i32, %arg1: i32) -> (i32, i32) {
    %c0_i32 = arith.constant 0 : i32
    %c0_i32_0 = arith.constant 0 : i32
    %c0_i32_1 = arith.constant 0 : i32
    return %c0_i32, %c0_i32_0 : i32, i32
  }
  func.func @transform_2(%arg0: i32, %arg1: i32) -> (i32, i32) {
    %c0_i32 = arith.constant 0 : i32
    %c0_i32_0 = arith.constant 0 : i32
    %c0_i32_1 = arith.constant 0 : i32
    return %c0_i32, %c0_i32_0 : i32, i32
  }
  func.func @transform_3(%arg0: i32, %arg1: i32) -> (i32, i32) {
    %c0_i32 = arith.constant 0 : i32
    %c0_i32_0 = arith.constant 0 : i32
    %c0_i32_1 = arith.constant 0 : i32
    return %c0_i32, %c0_i32_0 : i32, i32
  }
  func.func @transform_4(%arg0: i32, %arg1: i32) -> (i32, i32) {
    %c0_i32 = arith.constant 0 : i32
    %c0_i32_0 = arith.constant 0 : i32
    %c0_i32_1 = arith.constant 0 : i32
    return %c0_i32, %c0_i32_0 : i32, i32
  }
  func.func @transform_5(%arg0: i32, %arg1: i32) -> (i32, i32) {
    %c0_i32 = arith.constant 0 : i32
    %c0_i32_0 = arith.constant 0 : i32
    return %arg0, %c0_i32 : i32, i32
  }
}

module attributes {stable_mosaic.version = 11 : i64} {
  func.func @kernel(%arg0: i32, %arg1: i32, %arg2: memref<2x32x256xf32, #tpu.memory_space<vmem>>, %arg3: memref<32x16xf32, #tpu.memory_space<vmem>>, %arg4: memref<1x16xf32, #tpu.memory_space<vmem>>, %arg5: memref<16x8xf32, #tpu.memory_space<vmem>>, %arg6: memref<1x8xf32, #tpu.memory_space<vmem>>, %arg7: memref<2x8xf32, #tpu.memory_space<vmem>>, %arg8: memref<2x32xf32, #tpu.memory_space<vmem>>) attributes {dimension_semantics = [#tpu.dimension_semantics<parallel>, #tpu.dimension_semantics<arbitrary>], iteration_bounds = array<i64: 1, 1>, scalar_prefetch = 0 : i64, scratch_operands = 1 : i64, tpu.core_type = #tpu.core_type<tc>, window_params = [{transform_indices = @transform_0, window_bounds = array<i64: 2, 32, 256>}, {pipeline_mode = #tpu.pipeline_mode<synchronous>, transform_indices = @transform_1, window_bounds = array<i64: 32, 16>}, {pipeline_mode = #tpu.pipeline_mode<synchronous>, transform_indices = @transform_2, window_bounds = array<i64: 1, 16>}, {pipeline_mode = #tpu.pipeline_mode<synchronous>, transform_indices = @transform_3, window_bounds = array<i64: 16, 8>}, {pipeline_mode = #tpu.pipeline_mode<synchronous>, transform_indices = @transform_4, window_bounds = array<i64: 1, 8>}, {transform_indices = @transform_5, window_bounds = array<i64: 2, 8>}]} {
    %c0_i32 = arith.constant 0 : i32
    %0 = arith.cmpi eq, %arg1, %c0_i32 : i32
    %1 = arith.extui %0 : i1 to i32
    %c0_i32_0 = arith.constant 0 : i32
    %2 = arith.cmpi ne, %1, %c0_i32_0 : i32
    scf.if %2 {
      %cst_9 = arith.constant 0.000000e+00 : f32
      %11 = vector.broadcast %cst_9 : f32 to vector<2x32xf32>
      %c0_10 = arith.constant 0 : index
      %c0_11 = arith.constant 0 : index
      %12 = vector.load %arg8[%c0_10, %c0_11] : memref<2x32xf32, #tpu.memory_space<vmem>>, vector<2x32xf32>
      tpu.vector_store %arg8[%c0_10, %c0_11], %11 {strides = array<i32>} : memref<2x32xf32, #tpu.memory_space<vmem>>, vector<2x32xf32>,
    } else {
    }
    %c0 = arith.constant 0 : index
    %c0_1 = arith.constant 0 : index
    %3 = vector.load %arg8[%c0, %c0_1] : memref<2x32xf32, #tpu.memory_space<vmem>>, vector<2x32xf32>
    %c0_2 = arith.constant 0 : index
    %c0_3 = arith.constant 0 : index
    %c0_4 = arith.constant 0 : index
    %4 = vector.load %arg2[%c0_2, %c0_3, %c0_4] : memref<2x32x256xf32, #tpu.memory_space<vmem>>, vector<2x32x256xf32>
    %cst = arith.constant dense<0.000000e+00> : vector<2x32xf32>
    %5 = vector.multi_reduction <add>, %4, %cst [2] : vector<2x32x256xf32> to vector<2x32xf32>
    %6 = arith.addf %3, %5 : vector<2x32xf32>
    %c0_5 = arith.constant 0 : index
    %c0_6 = arith.constant 0 : index
    %7 = vector.load %arg8[%c0_5, %c0_6] : memref<2x32xf32, #tpu.memory_space<vmem>>, vector<2x32xf32>
    tpu.vector_store %arg8[%c0_5, %c0_6], %6 {strides = array<i32>} : memref<2x32xf32, #tpu.memory_space<vmem>>, vector<2x32xf32>,
    %c0_i32_7 = arith.constant 0 : i32
    %8 = arith.cmpi eq, %arg1, %c0_i32_7 : i32
    %9 = arith.extui %8 : i1 to i32
    %c0_i32_8 = arith.constant 0 : i32
    %10 = arith.cmpi ne, %9, %c0_i32_8 : i32
    scf.if %10 {
      %c0_9 = arith.constant 0 : index
      %c0_10 = arith.constant 0 : index
      %11 = vector.load %arg8[%c0_9, %c0_10] : memref<2x32xf32, #tpu.memory_space<vmem>>, vector<2x32xf32>
      %cst_11 = arith.constant 3.906250e-03 : f32
      %12 = vector.broadcast %cst_11 : f32 to vector<2x32xf32>
      %13 = arith.mulf %11, %12 : vector<2x32xf32>
      %c0_12 = arith.constant 0 : index
      %c0_13 = arith.constant 0 : index
      %14 = vector.load %arg3[%c0_12, %c0_13] : memref<32x16xf32, #tpu.memory_space<vmem>>, vector<32x16xf32>
      %cst_14 = arith.constant dense<0.000000e+00> : vector<2x16xf32>
      %15 = tpu.matmul %13, %14, %cst_14 {dimension_numbers = #tpu.dot_dimension_numbers<[1], [0], [0], [1], [0, 0, 1, 1], [], []>} : vector<2x32xf32>, vector<32x16xf32>, vector<2x16xf32> -> vector<2x16xf32>
      %c0_15 = arith.constant 0 : index
      %c0_16 = arith.constant 0 : index
      %16 = vector.load %arg4[%c0_15, %c0_16] : memref<1x16xf32, #tpu.memory_space<vmem>>, vector<1x16xf32>
      %17 = vector.broadcast %16 : vector<1x16xf32> to vector<2x16xf32>
      %18 = arith.addf %15, %17 : vector<2x16xf32>
      %19 = arith.negf %18 : vector<2x16xf32>
      %20 = math.exp %19 : vector<2x16xf32>
      %cst_17 = arith.constant 1.000000e+00 : f32
      %21 = vector.broadcast %cst_17 : f32 to vector<2x16xf32>
      %22 = arith.addf %21, %20 : vector<2x16xf32>
      %23 = arith.divf %21, %22 : vector<2x16xf32>
      %24 = arith.mulf %18, %23 : vector<2x16xf32>
      %c0_18 = arith.constant 0 : index
      %c0_19 = arith.constant 0 : index
      %25 = vector.load %arg5[%c0_18, %c0_19] : memref<16x8xf32, #tpu.memory_space<vmem>>, vector<16x8xf32>
      %cst_20 = arith.constant dense<0.000000e+00> : vector<2x8xf32>
      %26 = tpu.matmul %24, %25, %cst_20 {dimension_numbers = #tpu.dot_dimension_numbers<[1], [0], [0], [1], [0, 0, 1, 1], [], []>} : vector<2x16xf32>, vector<16x8xf32>, vector<2x8xf32> -> vector<2x8xf32>
      %c0_21 = arith.constant 0 : index
      %c0_22 = arith.constant 0 : index
      %27 = vector.load %arg6[%c0_21, %c0_22] : memref<1x8xf32, #tpu.memory_space<vmem>>, vector<1x8xf32>
      %28 = vector.broadcast %27 : vector<1x8xf32> to vector<2x8xf32>
      %29 = arith.addf %26, %28 : vector<2x8xf32>
      %c0_23 = arith.constant 0 : index
      %c0_24 = arith.constant 0 : index
      %30 = vector.load %arg7[%c0_23, %c0_24] : memref<2x8xf32, #tpu.memory_space<vmem>>, vector<2x8xf32>
      tpu.vector_store %arg7[%c0_23, %c0_24], %29 {strides = array<i32>} : memref<2x8xf32, #tpu.memory_space<vmem>>, vector<2x8xf32>,
    } else {
    }
    return
  }
  func.func @transform_0(%arg0: i32, %arg1: i32) -> (i32, i32, i32) {
    %c0_i32 = arith.constant 0 : i32
    %c0_i32_0 = arith.constant 0 : i32
    return %arg0, %c0_i32, %arg1 : i32, i32, i32
  }
  func.func @transform_1(%arg0: i32, %arg1: i32) -> (i32, i32) {
    %c0_i32 = arith.constant 0 : i32
    %c0_i32_0 = arith.constant 0 : i32
    %c0_i32_1 = arith.constant 0 : i32
    return %c0_i32, %c0_i32_0 : i32, i32
  }
  func.func @transform_2(%arg0: i32, %arg1: i32) -> (i32, i32) {
    %c0_i32 = arith.constant 0 : i32
    %c0_i32_0 = arith.constant 0 : i32
    %c0_i32_1 = arith.constant 0 : i32
    return %c0_i32, %c0_i32_0 : i32, i32
  }
  func.func @transform_3(%arg0: i32, %arg1: i32) -> (i32, i32) {
    %c0_i32 = arith.constant 0 : i32
    %c0_i32_0 = arith.constant 0 : i32
    %c0_i32_1 = arith.constant 0 : i32
    return %c0_i32, %c0_i32_0 : i32, i32
  }
  func.func @transform_4(%arg0: i32, %arg1: i32) -> (i32, i32) {
    %c0_i32 = arith.constant 0 : i32
    %c0_i32_0 = arith.constant 0 : i32
    %c0_i32_1 = arith.constant 0 : i32
    return %c0_i32, %c0_i32_0 : i32, i32
  }
  func.func @transform_5(%arg0: i32, %arg1: i32) -> (i32, i32) {
    %c0_i32 = arith.constant 0 : i32
    %c0_i32_0 = arith.constant 0 : i32
    return %arg0, %c0_i32 : i32, i32
  }
}

</mosaic_0001>

<bundles_post_ra>
// kernel: tpu_custom_call.1
= control target key start
LH: loop header
LB: loop body
LE: loop exit
PB: predicated region body
PF: predicated region fallthrough
CT: control target
= control target key end

     0   :  { %10 = vsyncpa [#allocation4], 0  ;;  %s501_s0 = inlined_call_operand.hbm [shape: f32[2,32,256], index: 0, kind: input, shape index: {}]   ;;  %s502_s1 = inlined_call_operand.vmem [shape: f32[32,16], index: 1, kind: input, shape index: {}]   ;;  %s503_s2 = inlined_call_operand.vmem [shape: f32[1,16], index: 2, kind: input, shape index: {}]   ;;  %s504_s3 = inlined_call_operand.vmem [shape: f32[16,8], index: 3, kind: input, shape index: {}]   ;;  %s505_s4 = inlined_call_operand.vmem [shape: f32[1,8], index: 4, kind: input, shape index: {}]   ;;  %s506_s5 = inlined_call_operand.hbm [shape: f32[2,8], index: 5, kind: output, shape index: {}]  }
   0x1   :  { %11 = vsyncpa [#allocation5], 0  ;;  %s424_s18 = smov [#allocation3]  }
   0x2   :  { %s17_s19 = sshll.u32 %s424_s18, 4  ;;  %s18_s19 = int_to_ptr.vmem [resolvable:$true] %s17_s19 }
   0x3   :  { %s388_s20 = scalar_lea.vmem %s18_s19, 2048  ;;  %p393_p1 = scmp.lt.s32.totalorder %s18_s19, %s18_s19 }
   0x4   :  { %p389_p0 = scmp.ne.s32.totalorder %s18_s19, %s388_s20  ;;  %p394_p2 = scmp.lt.s32.totalorder %s388_s20, %s388_s20 }
   0x6   :  { %p395_p3 = por %p394_p2, %p393_p1 }
   0x8   :  { %p396_p4 = pnand %p395_p3, %p389_p0 }
   0xa   :  { %399 = shalt.err (!%p396_p4)
}
   0xb   :  { %s425_s21 = smov 256   ;;  %s426_s22 = smov 16  }
   0xc   :  { %23 = dma.hbm_to_vmem [thread:$0]  %s501_s0, 2048, %s18_s19, [#allocation4], %s425_s21, %s425_s21, %s426_s22  }
   0xd   :  { %420 = dma.done.wait [#allocation4], 2048  }
   0xe   :  { %421 = vsyncadd [#allocation4], 4294965248  ;;  %v50_v0 = vld [vmem:[#allocation3 + $0x40] sm:$0xff]  ;;  %v51_v1 = vld [vmem:[#allocation3 + $0x48] sm:$0xff]  ;;  %vm39_vm0 = vcmask 254976   ;;  %v427_v24 = vmov 0.0   ;;  %v90_v29 = vlaneseq }
   0xf   :  { %v42_v2 = vld [vmem:[#allocation3] sm:$0xff]  ;;  %v70_v3 = vadd.f32 %v51_v1, %v50_v0  ;;  %v43_v4 = vld [vmem:[#allocation3 + $0x8] sm:$0xff]  ;;  %v52_v5 = vld [vmem:[#allocation3 + $0x50] sm:$0xff]  ;;  %40 = vst.msk [vmem:[#allocation2] sm:$0x3] %vm39_vm0, %v427_v24  ;;  %352 = vmatprep.subr.mxu0 %v427_v24  ;;  %363 = vmatprep.subr.mxu1 %v427_v24  ;;  %vm428_vm1 = vmmov 0  }
  0x10   :  { %v53_v6 = vld [vmem:[#allocation3 + $0x58] sm:$0xff]  ;;  %v58_v7 = vadd.f32 %v43_v4, %v42_v2  ;;  %v44_v8 = vld [vmem:[#allocation3 + $0x10] sm:$0xff]  ;;  %v54_v12 = vld [vmem:[#allocation3 + $0x60] sm:$0xff]  ;;  %360 = vmatprep.mubr.msk.f32.mxu0 %vm428_vm1, %v427_v24  ;;  %367 = vmatprep.mubr.msk.f32.mxu1 %vm428_vm1, %v427_v24  ;;  %v91_v30 = vand.u32 127, %v90_v29  ;;  %v93_v35 = vshrl.u32 %v90_v29, 7  ;;  %vm101_vm2 = vcmask 130112  }
  0x11   :  { %v45_v9 = vld [vmem:[#allocation3 + $0x18] sm:$0xff]  ;;  %71 = vadd.xlane.f32.xlu1 %v70_v3  ;;  %v73_v10 = vadd.f32 %v53_v6, %v52_v5  ;;  %v55_v13 = vld [vmem:[#allocation3 + $0x68] sm:$0xff]  ;;  %v46_v14 = vld [vmem:[#allocation3 + $0x20] sm:$0xff]  ;;  %vm108_vm3 = vcmask 195712   ;;  %vm115_vm4 = vcmask 261312   ;;  %vm136_vm5 = vcmask 1041409  }
  0x12   :  { %59 = vadd.xlane.f32.xlu0 %v58_v7  ;;  %v61_v11 = vadd.f32 %v45_v9, %v44_v8  ;;  %v47_v15 = vld [vmem:[#allocation3 + $0x28] sm:$0xff]  ;;  %v76_v16 = vadd.f32 %v55_v13, %v54_v12  ;;  %v56_v18 = vld [vmem:[#allocation3 + $0x70] sm:$0xff]  ;;  %v57_v19 = vld [vmem:[#allocation3 + $0x78] sm:$0xff]  ;;  %v96_v33 = vadd.s32 4294967288, %v91_v30  ;;  %v103_v34 = vadd.s32 4294967280, %v91_v30 }
  0x13   :  { %v64_v17 = vadd.f32 %v47_v15, %v46_v14  ;;  %v48_v20 = vld [vmem:[#allocation3 + $0x30] sm:$0xff]  ;;  %v49_v21 = vld [vmem:[#allocation3 + $0x38] sm:$0xff]  ;;  %v79_v22 = vadd.f32 %v57_v19, %v56_v18  ;;  %v148_v27 = vld [vmem:[%s502_s1 + $0x8] sm:$0xff]  ;;  %v110_v39 = vadd.s32 4294967272, %v91_v30  ;;  %v94_v41 = vsub.s32 %v91_v30, %v93_v35 }
  0x14   :  { %v67_v23 = vadd.f32 %v49_v21, %v48_v20  ;;  %v150_v25 = vld [vmem:[%s502_s1 + $0x18] sm:$0xff]  ;;  %v149_v26 = vld [vmem:[%s502_s1 + $0x10] sm:$0xff]  ;;  %v147_v28 = vld [vmem:[%s502_s1] sm:$0xff]  ;;  %v99_v37 = vsub.s32 %v96_v33, %v93_v35  ;;  %v106_v40 = vsub.s32 %v103_v34, %v93_v35  ;;  %vm158_vm6 = vcmask 261120  }
  0x15   :  { %74 = vadd.xlane.f32.xlu1 %v73_v10  ;;  %353 = vmatpush3.msra.mxu0 %v150_v25  ;;  %v113_v45 = vsub.s32 %v110_v39, %v93_v35  ;;  %v240_v2 = vld [vmem:[%s504_s3 + $0x8] sm:$0xff]  ;;  %v239_v3 = vld [vmem:[%s504_s3] sm:$0xff]  ;;  %vm248_vm7 = vcmask 130048   ;;  %s429_s3 = smov [#allocation6]   ;;  %vm322_vm8 = vcmask 58368  }
  0x16   :  { %62 = vadd.xlane.f32.xlu0 %v61_v11  ;;  %354 = vmatprep.subr.mxu0 %v427_v24  ;;  %v41_v60 = vld [vmem:[#allocation2] sm:$0x3]  ;;  %s330_s14 = sshll.u32 %s429_s3, 4  ;;  %s331_s14 = int_to_ptr.vmem [resolvable:$true] %s330_s14 }
  0x17   :  { %355 = vmatpush3.msra.mxu0 %v149_v26  ;;  %364 = vmatpush3.msra.mxu1 %v240_v2  ;;  %v339_v4 = vld [vmem:[%s503_s2] ss:$0 sm:$0xff]  ;;  %s400_s2 = scalar_lea.vmem %s331_s14, 32  ;;  %p405_p6 = scmp.lt.s32.totalorder %s331_s14, %s331_s14 }
  0x18   :  { %356 = vmatprep.subr.mxu0 %v427_v24  ;;  %365 = vmatprep.subr.mxu1 %v427_v24  ;;  %v342_v13 = vld [vmem:[%s505_s4] ss:$0 sm:$0xff]  ;;  %p401_p5 = scmp.ne.s32.totalorder %s331_s14, %s400_s2  ;;  %p406_p7 = scmp.lt.s32.totalorder %s400_s2, %s400_s2 }
  0x19   :  { %77 = vadd.xlane.f32.xlu1 %v76_v16  ;;  %357 = vmatpush3.msra.mxu0 %v148_v27 }
  0x1a   :  { %65 = vadd.xlane.f32.xlu0 %v64_v17  ;;  %358 = vmatprep.subr.mxu0 %v427_v24  ;;  %p407_p8 = por %p406_p7, %p405_p6 }
  0x1b   :  { %359 = vmatpush3.msra.mxu0 %v147_v28  ;;  %366 = vmatpush3.msra.mxu1 %v239_v3 }
  0x1c   :  { %p408_p9 = pnand %p407_p8, %p401_p5 }
  0x1d   :  { %80 = vadd.xlane.f32.xlu1 %v79_v22 }
  0x1e   :  { %68 = vadd.xlane.f32.xlu0 %v67_v23 }
  0x9a   :  { %v72_v31 = vpop.xlane.xlu1 %71 }
  0x9b   :  { %v60_v32 = vpop.xlane.xlu0 %59  ;;  %v120_v48 = vrot.slane %v72_v31, %v94_v41 }
  0x9c   :  { %v95_v50 = vrot.slane %v60_v32, %v94_v41 }
  0x9e   :  { %v75_v36 = vpop.xlane.xlu1 %74 }
  0x9f   :  { %v63_v38 = vpop.xlane.xlu0 %62  ;;  %v124_v43 = vrot.slane %v75_v36, %v99_v37 }
  0xa0   :  { %v100_v46 = vrot.slane %v63_v38, %v99_v37 }
  0xa1   :  { %v125_v52 = vsel %vm101_vm2, %v124_v43, %v120_v48 }
  0xa2   :  { %v78_v42 = vpop.xlane.xlu1 %77  ;;  %v102_v55 = vsel %vm101_vm2, %v100_v46, %v95_v50 }
  0xa3   :  { %v66_v44 = vpop.xlane.xlu0 %65  ;;  %v129_v47 = vrot.slane %v78_v42, %v106_v40 }
  0xa4   :  { %v107_v49 = vrot.slane %v66_v44, %v106_v40 }
  0xa5   :  { %v130_v56 = vsel %vm108_vm3, %v129_v47, %v125_v52 }
  0xa6   :  { %v81_v51 = vpop.xlane.xlu1 %80  ;;  %v109_v58 = vsel %vm108_vm3, %v107_v49, %v102_v55 }
  0xa7   :  { %v134_v53 = vrot.slane %v81_v51, %v113_v45  ;;  %v69_v54 = vpop.xlane.xlu0 %68 }
  0xa8   :  { %v114_v57 = vrot.slane %v69_v54, %v113_v45 }
  0xa9   :  { %v135_v59 = vsel %vm115_vm4, %v134_v53, %v130_v56 }
  0xaa   :  { %v116_v61 = vsel %vm115_vm4, %v114_v57, %v109_v58 }
  0xab   :  { %v137_v62 = vsel %vm136_vm5, %v135_v59, %v116_v61 }
  0xac   :  { %v139_v63 = vadd.f32 %v137_v62, %v41_v60 }
  0xae   :  { %141 = vst.msk [vmem:[#allocation2] sm:$0x3] %vm39_vm0, %v139_v63 }
  0xb5   :  { %v145_v0 = vld [vmem:[#allocation2] sm:$0x3] }
  0xb6   :  { %v146_v1 = vmul.f32 0.00390625, %v145_v0 }
  0xb8   :  { %361 = vmatmul.mubr.msk.f32.vlgmr.msra.gmra.mxu0 %vm158_vm6, %v146_v1 }
 0x178   :  { %v228_v5 = vpop.f32.mrf.mxu0 }
 0x179   :  { %v229_v6 = vadd.f32 %v339_v4, %v228_v5 }
 0x17a   :  { %v362_v7 = vpop.f32.mrf.mxu0 }
 0x17b   :  { %v341_v8 = vmul.f32 -1.442695, %v229_v6 }
 0x17d   :  { %376 = vpow2.f32 %v341_v8 }
 0x18a   :  { %v377_v9 = vpop.eup %376 }
 0x18b   :  { %v235_v10 = vadd.f32 1.0, %v377_v9 }
 0x18d   :  { %378 = vrcp.f32 %v235_v10 }
 0x19a   :  { %v379_v11 = vpop.eup %378 }
 0x19b   :  { %v238_v12 = vmul.f32 %v379_v11, %v229_v6 }
 0x19d   :  { %368 = vmatmul.mubr.msk.f32.vlgmr.msra.gmra.mxu1 %vm248_vm7, %v238_v12 }
 0x25d   :  { %v318_v14 = vpop.f32.mrf.mxu1 }
 0x25e   :  { %v319_v15 = vadd.f32 %v342_v13, %v318_v14 }
 0x25f   :  { %v369_v16 = vpop.f32.mrf.mxu1 }
 0x260   :  { %323 = vst.msk [vmem:[#allocation6] sm:$0x3] %vm322_vm8, %v319_v15 }
 0x261   :  { %411 = shalt.err (!%p408_p9)
}
 0x262   :  { %333 = dma.vmem_to_hbm [thread:$0]  %s331_s14, 32, %s506_s5, [#allocation5]  }
 0x263   :  { %422 = dma.done.wait [#allocation5], 32  }
 0x264   :  { %423 = vsyncadd [#allocation5], 4294967264 }
 0x265   :  { %337 = vsyncpa [#allocation4], 1 }
 0x266   :  { %338 = vsyncpa [#allocation5], 1 }

// kernel: tpu_custom_call.1
= control target key start
LH: loop header
LB: loop body
LE: loop exit
PB: predicated region body
PF: predicated region fallthrough
CT: control target
= control target key end

     0   :  { %10 = vsyncpa [#allocation4], 0  ;;  %s501_s0 = inlined_call_operand.hbm [shape: f32[2,32,256], index: 0, kind: input, shape index: {}]   ;;  %s502_s1 = inlined_call_operand.vmem [shape: f32[32,16], index: 1, kind: input, shape index: {}]   ;;  %s503_s2 = inlined_call_operand.vmem [shape: f32[1,16], index: 2, kind: input, shape index: {}]   ;;  %s504_s3 = inlined_call_operand.vmem [shape: f32[16,8], index: 3, kind: input, shape index: {}]   ;;  %s505_s4 = inlined_call_operand.vmem [shape: f32[1,8], index: 4, kind: input, shape index: {}]   ;;  %s506_s5 = inlined_call_operand.hbm [shape: f32[2,8], index: 5, kind: output, shape index: {}]  }
   0x1   :  { %11 = vsyncpa [#allocation5], 0  ;;  %s424_s18 = smov [#allocation3]  }
   0x2   :  { %s17_s19 = sshll.u32 %s424_s18, 4  ;;  %s18_s19 = int_to_ptr.vmem [resolvable:$true] %s17_s19 }
   0x3   :  { %s388_s20 = scalar_lea.vmem %s18_s19, 2048  ;;  %p393_p1 = scmp.lt.s32.totalorder %s18_s19, %s18_s19 }
   0x4   :  { %p389_p0 = scmp.ne.s32.totalorder %s18_s19, %s388_s20  ;;  %p394_p2 = scmp.lt.s32.totalorder %s388_s20, %s388_s20 }
   0x6   :  { %p395_p3 = por %p394_p2, %p393_p1 }
   0x8   :  { %p396_p4 = pnand %p395_p3, %p389_p0 }
   0xa   :  { %399 = shalt.err (!%p396_p4)
}
   0xb   :  { %s425_s21 = smov 256   ;;  %s426_s22 = smov 16  }
   0xc   :  { %23 = dma.hbm_to_vmem [thread:$0]  %s501_s0, 2048, %s18_s19, [#allocation4], %s425_s21, %s425_s21, %s426_s22  }
   0xd   :  { %420 = dma.done.wait [#allocation4], 2048  }
   0xe   :  { %421 = vsyncadd [#allocation4], 4294965248  ;;  %v50_v0 = vld [vmem:[#allocation3 + $0x40] sm:$0xff]  ;;  %v51_v1 = vld [vmem:[#allocation3 + $0x48] sm:$0xff]  ;;  %vm39_vm0 = vcmask 254976   ;;  %v427_v24 = vmov 0.0   ;;  %v90_v29 = vlaneseq }
   0xf   :  { %v42_v2 = vld [vmem:[#allocation3] sm:$0xff]  ;;  %v70_v3 = vadd.f32 %v51_v1, %v50_v0  ;;  %v43_v4 = vld [vmem:[#allocation3 + $0x8] sm:$0xff]  ;;  %v52_v5 = vld [vmem:[#allocation3 + $0x50] sm:$0xff]  ;;  %40 = vst.msk [vmem:[#allocation2] sm:$0x3] %vm39_vm0, %v427_v24  ;;  %352 = vmatprep.subr.mxu0 %v427_v24  ;;  %363 = vmatprep.subr.mxu1 %v427_v24  ;;  %vm428_vm1 = vmmov 0  }
  0x10   :  { %v53_v6 = vld [vmem:[#allocation3 + $0x58] sm:$0xff]  ;;  %v58_v7 = vadd.f32 %v43_v4, %v42_v2  ;;  %v44_v8 = vld [vmem:[#allocation3 + $0x10] sm:$0xff]  ;;  %v54_v12 = vld [vmem:[#allocation3 + $0x60] sm:$0xff]  ;;  %360 = vmatprep.mubr.msk.f32.mxu0 %vm428_vm1, %v427_v24  ;;  %367 = vmatprep.mubr.msk.f32.mxu1 %vm428_vm1, %v427_v24  ;;  %v91_v30 = vand.u32 127, %v90_v29  ;;  %v93_v35 = vshrl.u32 %v90_v29, 7  ;;  %vm101_vm2 = vcmask 130112  }
  0x11   :  { %v45_v9 = vld [vmem:[#allocation3 + $0x18] sm:$0xff]  ;;  %71 = vadd.xlane.f32.xlu1 %v70_v3  ;;  %v73_v10 = vadd.f32 %v53_v6, %v52_v5  ;;  %v55_v13 = vld [vmem:[#allocation3 + $0x68] sm:$0xff]  ;;  %v46_v14 = vld [vmem:[#allocation3 + $0x20] sm:$0xff]  ;;  %vm108_vm3 = vcmask 195712   ;;  %vm115_vm4 = vcmask 261312   ;;  %vm136_vm5 = vcmask 1041409  }
  0x12   :  { %59 = vadd.xlane.f32.xlu0 %v58_v7  ;;  %v61_v11 = vadd.f32 %v45_v9, %v44_v8  ;;  %v47_v15 = vld [vmem:[#allocation3 + $0x28] sm:$0xff]  ;;  %v76_v16 = vadd.f32 %v55_v13, %v54_v12  ;;  %v56_v18 = vld [vmem:[#allocation3 + $0x70] sm:$0xff]  ;;  %v57_v19 = vld [vmem:[#allocation3 + $0x78] sm:$0xff]  ;;  %v96_v33 = vadd.s32 4294967288, %v91_v30  ;;  %v103_v34 = vadd.s32 4294967280, %v91_v30 }
  0x13   :  { %v64_v17 = vadd.f32 %v47_v15, %v46_v14  ;;  %v48_v20 = vld [vmem:[#allocation3 + $0x30] sm:$0xff]  ;;  %v49_v21 = vld [vmem:[#allocation3 + $0x38] sm:$0xff]  ;;  %v79_v22 = vadd.f32 %v57_v19, %v56_v18  ;;  %v148_v27 = vld [vmem:[%s502_s1 + $0x8] sm:$0xff]  ;;  %v110_v39 = vadd.s32 4294967272, %v91_v30  ;;  %v94_v41 = vsub.s32 %v91_v30, %v93_v35 }
  0x14   :  { %v67_v23 = vadd.f32 %v49_v21, %v48_v20  ;;  %v150_v25 = vld [vmem:[%s502_s1 + $0x18] sm:$0xff]  ;;  %v149_v26 = vld [vmem:[%s502_s1 + $0x10] sm:$0xff]  ;;  %v147_v28 = vld [vmem:[%s502_s1] sm:$0xff]  ;;  %v99_v37 = vsub.s32 %v96_v33, %v93_v35  ;;  %v106_v40 = vsub.s32 %v103_v34, %v93_v35  ;;  %vm158_vm6 = vcmask 261120  }
  0x15   :  { %74 = vadd.xlane.f32.xlu1 %v73_v10  ;;  %353 = vmatpush3.msra.mxu0 %v150_v25  ;;  %v113_v45 = vsub.s32 %v110_v39, %v93_v35  ;;  %v240_v2 = vld [vmem:[%s504_s3 + $0x8] sm:$0xff]  ;;  %v239_v3 = vld [vmem:[%s504_s3] sm:$0xff]  ;;  %vm248_vm7 = vcmask 130048   ;;  %s429_s3 = smov [#allocation6]   ;;  %vm322_vm8 = vcmask 58368  }
  0x16   :  { %62 = vadd.xlane.f32.xlu0 %v61_v11  ;;  %354 = vmatprep.subr.mxu0 %v427_v24  ;;  %v41_v60 = vld [vmem:[#allocation2] sm:$0x3]  ;;  %s330_s14 = sshll.u32 %s429_s3, 4  ;;  %s331_s14 = int_to_ptr.vmem [resolvable:$true] %s330_s14 }
  0x17   :  { %355 = vmatpush3.msra.mxu0 %v149_v26  ;;  %364 = vmatpush3.msra.mxu1 %v240_v2  ;;  %v339_v4 = vld [vmem:[%s503_s2] ss:$0 sm:$0xff]  ;;  %s400_s2 = scalar_lea.vmem %s331_s14, 32  ;;  %p405_p6 = scmp.lt.s32.totalorder %s331_s14, %s331_s14 }
  0x18   :  { %356 = vmatprep.subr.mxu0 %v427_v24  ;;  %365 = vmatprep.subr.mxu1 %v427_v24  ;;  %v342_v13 = vld [vmem:[%s505_s4] ss:$0 sm:$0xff]  ;;  %p401_p5 = scmp.ne.s32.totalorder %s331_s14, %s400_s2  ;;  %p406_p7 = scmp.lt.s32.totalorder %s400_s2, %s400_s2 }
  0x19   :  { %77 = vadd.xlane.f32.xlu1 %v76_v16  ;;  %357 = vmatpush3.msra.mxu0 %v148_v27 }
  0x1a   :  { %65 = vadd.xlane.f32.xlu0 %v64_v17  ;;  %358 = vmatprep.subr.mxu0 %v427_v24  ;;  %p407_p8 = por %p406_p7, %p405_p6 }
  0x1b   :  { %359 = vmatpush3.msra.mxu0 %v147_v28  ;;  %366 = vmatpush3.msra.mxu1 %v239_v3 }
  0x1c   :  { %p408_p9 = pnand %p407_p8, %p401_p5 }
  0x1d   :  { %80 = vadd.xlane.f32.xlu1 %v79_v22 }
  0x1e   :  { %68 = vadd.xlane.f32.xlu0 %v67_v23 }
  0x9a   :  { %v72_v31 = vpop.xlane.xlu1 %71 }
  0x9b   :  { %v60_v32 = vpop.xlane.xlu0 %59  ;;  %v120_v48 = vrot.slane %v72_v31, %v94_v41 }
  0x9c   :  { %v95_v50 = vrot.slane %v60_v32, %v94_v41 }
  0x9e   :  { %v75_v36 = vpop.xlane.xlu1 %74 }
  0x9f   :  { %v63_v38 = vpop.xlane.xlu0 %62  ;;  %v124_v43 = vrot.slane %v75_v36, %v99_v37 }
  0xa0   :  { %v100_v46 = vrot.slane %v63_v38, %v99_v37 }
  0xa1   :  { %v125_v52 = vsel %vm101_vm2, %v124_v43, %v120_v48 }
  0xa2   :  { %v78_v42 = vpop.xlane.xlu1 %77  ;;  %v102_v55 = vsel %vm101_vm2, %v100_v46, %v95_v50 }
  0xa3   :  { %v66_v44 = vpop.xlane.xlu0 %65  ;;  %v129_v47 = vrot.slane %v78_v42, %v106_v40 }
  0xa4   :  { %v107_v49 = vrot.slane %v66_v44, %v106_v40 }
  0xa5   :  { %v130_v56 = vsel %vm108_vm3, %v129_v47, %v125_v52 }
  0xa6   :  { %v81_v51 = vpop.xlane.xlu1 %80  ;;  %v109_v58 = vsel %vm108_vm3, %v107_v49, %v102_v55 }
  0xa7   :  { %v134_v53 = vrot.slane %v81_v51, %v113_v45  ;;  %v69_v54 = vpop.xlane.xlu0 %68 }
  0xa8   :  { %v114_v57 = vrot.slane %v69_v54, %v113_v45 }
  0xa9   :  { %v135_v59 = vsel %vm115_vm4, %v134_v53, %v130_v56 }
  0xaa   :  { %v116_v61 = vsel %vm115_vm4, %v114_v57, %v109_v58 }
  0xab   :  { %v137_v62 = vsel %vm136_vm5, %v135_v59, %v116_v61 }
  0xac   :  { %v139_v63 = vadd.f32 %v137_v62, %v41_v60 }
  0xae   :  { %141 = vst.msk [vmem:[#allocation2] sm:$0x3] %vm39_vm0, %v139_v63 }
  0xb5   :  { %v145_v0 = vld [vmem:[#allocation2] sm:$0x3] }
  0xb6   :  { %v146_v1 = vmul.f32 0.00390625, %v145_v0 }
  0xb8   :  { %361 = vmatmul.mubr.msk.f32.vlgmr.msra.gmra.mxu0 %vm158_vm6, %v146_v1 }
 0x178   :  { %v228_v5 = vpop.f32.mrf.mxu0 }
 0x179   :  { %v229_v6 = vadd.f32 %v339_v4, %v228_v5 }
 0x17a   :  { %v362_v7 = vpop.f32.mrf.mxu0 }
 0x17b   :  { %v341_v8 = vmul.f32 -1.442695, %v229_v6 }
 0x17d   :  { %376 = vpow2.f32 %v341_v8 }
 0x18a   :  { %v377_v9 = vpop.eup %376 }
 0x18b   :  { %v235_v10 = vadd.f32 1.0, %v377_v9 }
 0x18d   :  { %378 = vrcp.f32 %v235_v10 }
 0x19a   :  { %v379_v11 = vpop.eup %378 }
 0x19b   :  { %v238_v12 = vmul.f32 %v379_v11, %v229_v6 }
 0x19d   :  { %368 = vmatmul.mubr.msk.f32.vlgmr.msra.gmra.mxu1 %vm248_vm7, %v238_v12 }
 0x25d   :  { %v318_v14 = vpop.f32.mrf.mxu1 }
 0x25e   :  { %v319_v15 = vadd.f32 %v342_v13, %v318_v14 }
 0x25f   :  { %v369_v16 = vpop.f32.mrf.mxu1 }
 0x260   :  { %323 = vst.msk [vmem:[#allocation6] sm:$0x3] %vm322_vm8, %v319_v15 }
 0x261   :  { %411 = shalt.err (!%p408_p9)
}
 0x262   :  { %333 = dma.vmem_to_hbm [thread:$0]  %s331_s14, 32, %s506_s5, [#allocation5]  }
 0x263   :  { %422 = dma.done.wait [#allocation5], 32  }
 0x264   :  { %423 = vsyncadd [#allocation5], 4294967264 }
 0x265   :  { %337 = vsyncpa [#allocation4], 1 }
 0x266   :  { %338 = vsyncpa [#allocation5], 1 }

</bundles_post_ra>
